<compile_context>
chip_gen: v7x
topology: tpu7x:2x2x1
jax: 0.10.0
libtpu: 0.0.40
codegen_flags: <defaults>
</compile_context>

<pallas_src>
import functools

import jax
import jax.numpy as jnp
from jax import lax
from jax.experimental import pallas as pl
from jax.experimental.pallas import tpu as pltpu  # noqa: F401  (no scratch/grid needed here)

SELU_ALPHA = 1.6732632423543772
SELU_SCALE = 1.0507009873554804


def _selu(x):
    return SELU_SCALE * jnp.where(x > 0, x, SELU_ALPHA * (jnp.exp(x) - 1.0))


def _band_weight(w_hwio, W, padW):
    """(KH, KW, Ci, Co) conv weight -> per-kh banded matmul matrices (KH, W*Ci, W*Co).

    band[kh][wi*Ci+ci, wo*Co+co] = w[kh, kw, ci, co] iff wi == wo + kw - padW,
    i.e. the width padding and all kw taps are folded into one matrix per kh.
    """
    KH, KW, Ci, Co = w_hwio.shape
    kw = jnp.arange(KW)[:, None, None]            # (KW, 1, 1)
    wi = jnp.arange(W)[None, :, None]             # (1,  W, 1)
    wo = jnp.arange(W)[None, None, :]             # (1,  1, W)
    mask = (wi == wo + kw - padW).astype(w_hwio.dtype)          # (KW, Wi, Wo)
    m = jnp.einsum("kio,hkcd->hicod", mask, w_hwio)             # (KH, Wi, Ci, Wo, Co)
    return m.reshape(KH, W * Ci, W * Co)


def _resblock_kernel(*refs, N, H, hp, wcout, downsample):
    if downsample:
        l1_ref, wf_ref, w2_ref, s2_ref, t2_ref, b_ref, out_ref = refs
    else:
        l1_ref, wf_ref, xid_ref, w2_ref, s2_ref, t2_ref, b_ref, out_ref = refs

    # conv1 (both kh taps, K = 2*W*Cin) and, when downsampling, the 1x3 identity conv
    # fused as extra output lanes -> a single (M, 2*W*Cout) MXU matmul.
    fused = jnp.dot(l1_ref[...], wf_ref[...], preferred_element_type=jnp.float32)
    if downsample:
        out1 = fused[:, :wcout]        # conv1 pre-activation (vreg-aligned lane split)
        idn = fused[:, wcout:]         # downsample identity (its bias folded into b_ref)
    else:
        out1 = fused
        idn = xid_ref[...]             # identity = x, pre-aligned in the wrapper

    # bn2 (inference affine; conv1 bias folded into the shift) + SELU; stays in vregs.
    mid = _selu(out1 * s2_ref[...] + t2_ref[...])               # (N*hp, wcout)

    # conv2 kh=0 tap + all biases + identity ...
    base = (jnp.dot(mid, w2_ref[0], preferred_element_type=jnp.float32)
            + b_ref[...] + idn)
    # ... plus the kh=1 tap on the row-shifted mid (only off-by-one slice left; ~6 vregs).
    t1 = jnp.dot(mid[1:, :], w2_ref[1], preferred_element_type=jnp.float32)

    # Per-batch row blocks start at multiples of hp (multiple of 8) -> aligned stores.
    for n in range(N):                 # static unroll, N is tiny
        r0 = n * hp
        out_ref[n] = (base[r0:r0 + H, :] + t1[r0:r0 + H, :]).astype(out_ref.dtype)


def prepare_residual_block(params, *, W, Cin, Cout, downsample):
    """One-time (hoisted out of the hot path) construction of band matrices / affines."""
    f32 = jnp.float32
    WCin, WCout = W * Cin, W * Cout
    # conv1: stack the two kh taps along K -> (2*W*Cin, W*Cout).
    w1s = _band_weight(params["w1"].astype(f32), W, 1).reshape(2 * WCin, WCout)
    if downsample:
        wd = _band_weight(params["wds"].astype(f32), W, 1)[0]            # (WCin, WCout)
        # Identity conv reads Xpad[r+1] = x[r], i.e. the SECOND lane half of L1.
        wd_ext = jnp.concatenate([jnp.zeros_like(wd), wd], axis=0)       # (2*WCin, WCout)
        w_fused = jnp.concatenate([w1s, wd_ext], axis=1)                 # (2*WCin, 2*WCout)
        bias = params["b2"] + params["bds"]
    else:
        w_fused = w1s
        bias = params["b2"]
    return dict(
        w_fused=w_fused,
        w2=_band_weight(params["w2"].astype(f32), W, 1),                  # (2, WCout, WCout)
        s2=jnp.tile(params["s2"], (1, W)).astype(f32),                    # (1, W*Cout)
        t2=jnp.tile(params["t2"] + params["b1"] * params["s2"], (1, W)).astype(f32),
        bias=jnp.tile(bias, (1, W)).astype(f32),
    )


def residual_block_lane(x_lane, prep, *, N, H, W, Cin, Cout, downsample, hp):
    """Lane-dense hot path: x_lane (N, H, W*Cin) float32 -> (N, H, W*Cout) float32."""
    WCin, WCout = W * Cin, W * Cout
    rows = N * hp

    # L1[n, r] = [Xpad[r] | Xpad[r+1]], Xpad = [0, x_0..x_{H-1}, 0, 0...]: fuses both kh
    # taps of conv1 into one K = 2*W*Cin contraction and removes in-kernel row shifts.
    xz = jnp.pad(x_lane.astype(jnp.float32), ((0, 0), (1, hp - H), (0, 0)))  # (N, hp+1, WCin)
    l1 = jnp.concatenate([xz[:, :hp, :], xz[:, 1:, :]], axis=-1).reshape(rows, 2 * WCin)

    if downsample:
        args = (l1, prep["w_fused"], prep["w2"], prep["s2"], prep["t2"], prep["bias"])
    else:
        # identity = x, laid out at offset 0 of each hp-row block (no off-by-one).
        xid = jnp.pad(x_lane.astype(jnp.float32),
                      ((0, 0), (0, hp - H), (0, 0))).reshape(rows, WCout)
        args = (l1, prep["w_fused"], xid, prep["w2"], prep["s2"], prep["t2"], prep["bias"])

    kernel = functools.partial(_resblock_kernel, N=N, H=H, hp=hp, wcout=WCout,
                               downsample=downsample)

    k1, n1 = 2 * WCin, prep["w_fused"].shape[-1]
    cost = pl.CostEstimate(
        flops=2 * rows * k1 * n1 + 4 * rows * WCout * WCout + 8 * rows * WCout,
        transcendentals=rows * WCout,
        bytes_accessed=4 * (rows * k1 + k1 * n1 + 2 * WCout * WCout + 3 * WCout
                            + N * H * WCout + (0 if downsample else rows * WCout)),
    )

    # Grid-less call: the whole batch is one M = N*hp matmul slab; every operand is a
    # single whole-array VMEM block (total footprint ~0.4 MiB), so there is nothing to
    # pipeline, no per-grid-step overhead, and no duplicated weight DMAs.
    return pl.pallas_call(
        kernel,
        out_shape=jax.ShapeDtypeStruct((N, H, WCout), jnp.float32),
        cost_estimate=cost,
    )(*args)


def residual_block_nchw(x_nchw, prep, *, H, W, Cin, Cout, downsample, hp):
    """PyTorch-layout convenience wrapper.  When residual blocks are chained, keep the
    activations in the lane-dense (N, H, W*C) layout and call residual_block_lane
    directly so these transposes vanish from the hot path."""
    N = x_nchw.shape[0]
    x_lane = jnp.transpose(x_nchw, (0, 2, 3, 1)).reshape(N, H, W * Cin)
    out_lane = residual_block_lane(x_lane, prep, N=N, H=H, W=W, Cin=Cin, Cout=Cout,
                                   downsample=downsample, hp=hp)
    return jnp.transpose(out_lane.reshape(N, H, W, Cout), (0, 3, 1, 2))


def ref_forward_nhwc(x_nhwc, p, downsample):
    """Pure-JAX reference (inference-mode BN), NHWC, full-f32 conv precision."""
    dn = ("NHWC", "HWIO", "NHWC")
    hi = lax.Precision.HIGHEST
    y = lax.conv_general_dilated(x_nhwc, p["w1"], (1, 1), ((1, 1), (1, 1)),
                                 dimension_numbers=dn, precision=hi) + p["b1"]
    y = _selu(y * p["s2"] + p["t2"])
    y = lax.conv_general_dilated(y, p["w2"], (1, 1), ((0, 0), (1, 1)),
                                 dimension_numbers=dn, precision=hi) + p["b2"]
    if downsample:
        idn = lax.conv_general_dilated(x_nhwc, p["wds"], (1, 1), ((0, 0), (1, 1)),
                                       dimension_numbers=dn, precision=hi) + p["bds"]
    else:
        idn = x_nhwc
    return y + idn


if __name__ == "__main__":
    # nb_filts = [4, 8] -> Cin != Cout -> downsample path; first=False (bn1 branch is dead).
    N, Cin, Cout, H, W = 2, 4, 8, 16, 16
    downsample = Cin != Cout
    hp = -(-(H + 2) // 8) * 8          # per-batch row block, 8-aligned (here 24)

    key = jax.random.PRNGKey(0)
    ks = jax.random.split(key, 11)
    x = jax.random.normal(ks[0], (N, Cin, H, W), jnp.float32)

    # Deterministic synthetic parameters (HWIO conv weights).
    w1 = 0.15 * jax.random.normal(ks[1], (2, 3, Cin, Cout), jnp.float32)
    b1 = 0.10 * jax.random.normal(ks[2], (1, Cout), jnp.float32)
    w2 = 0.15 * jax.random.normal(ks[3], (2, 3, Cout, Cout), jnp.float32)
    b2 = 0.10 * jax.random.normal(ks[4], (1, Cout), jnp.float32)
    wds = 0.15 * jax.random.normal(ks[5], (1, 3, Cin, Cout), jnp.float32)
    bds = 0.10 * jax.random.normal(ks[6], (1, Cout), jnp.float32)
    # BatchNorm2d(Cout) in inference mode folded to a per-channel affine.
    gamma = 1.0 + 0.1 * jax.random.normal(ks[7], (1, Cout), jnp.float32)
    beta = 0.1 * jax.random.normal(ks[8], (1, Cout), jnp.float32)
    r_mean = 0.1 * jax.random.normal(ks[9], (1, Cout), jnp.float32)
    r_var = 1.0 + 0.1 * jnp.abs(jax.random.normal(ks[10], (1, Cout), jnp.float32))
    eps = 1e-5
    s2 = gamma / jnp.sqrt(r_var + eps)
    t2 = beta - r_mean * s2
    # TODO(synk): PyTorch default training-mode BN uses batch statistics; this kernel
    # implements inference-mode (running-stats) BN as a per-channel affine.

    params = dict(w1=w1, b1=b1, w2=w2, b2=b2, wds=wds, bds=bds, s2=s2, t2=t2)

    # One-time parameter prep (band matrices, tiled affines) — hoisted out of the hot path.
    prep = prepare_residual_block(params, W=W, Cin=Cin, Cout=Cout, downsample=downsample)

    fwd = jax.jit(functools.partial(residual_block_nchw, H=H, W=W, Cin=Cin, Cout=Cout,
                                    downsample=downsample, hp=hp))
    out = fwd(x, prep)
    jax.block_until_ready(out)

    x_nhwc = jnp.transpose(x, (0, 2, 3, 1))
    ref = jnp.transpose(ref_forward_nhwc(x_nhwc, params, downsample), (0, 3, 1, 2))
    assert out.shape == (N, Cout, H, W)
    # Tolerance covers a possible bf16-pass lowering of the f32 matmuls on either side
    # (MXU path vs XLA reference conv); when both run f32-accurate the error is ~1e-6.
    err = float(jnp.max(jnp.abs(out - ref)))
    assert jnp.allclose(out, ref, atol=2e-2, rtol=2e-2), f"max err {err}"

    print("KERNEL_OK")
</pallas_src>

<mosaic_0001>
module attributes {stable_mosaic.version = 11 : i64} {
  func.func @_resblock_kernel(%arg0: memref<48x128xf32, #tpu.memory_space<vmem>>, %arg1: memref<128x256xf32, #tpu.memory_space<vmem>>, %arg2: memref<2x128x128xf32, #tpu.memory_space<vmem>>, %arg3: memref<1x128xf32, #tpu.memory_space<vmem>>, %arg4: memref<1x128xf32, #tpu.memory_space<vmem>>, %arg5: memref<1x128xf32, #tpu.memory_space<vmem>>, %arg6: memref<2x16x128xf32, #tpu.memory_space<vmem>>) attributes {dimension_semantics = [], scalar_prefetch = 0 : i64, scratch_operands = 0 : i64, tpu.core_type = #tpu.core_type<tc>} {
    %c0 = arith.constant 0 : index
    %c0_0 = arith.constant 0 : index
    %0 = vector.load %arg0[%c0, %c0_0] : memref<48x128xf32, #tpu.memory_space<vmem>>, vector<48x128xf32>
    %c0_1 = arith.constant 0 : index
    %c0_2 = arith.constant 0 : index
    %1 = vector.load %arg1[%c0_1, %c0_2] : memref<128x256xf32, #tpu.memory_space<vmem>>, vector<128x256xf32>
    %cst = arith.constant dense<0.000000e+00> : vector<48x256xf32>
    %2 = tpu.matmul %0, %1, %cst {dimension_numbers = #tpu.dot_dimension_numbers<[1], [0], [0], [1], [0, 0, 1, 1], [], []>} : vector<48x128xf32>, vector<128x256xf32>, vector<48x256xf32> -> vector<48x256xf32>
    %3 = vector.extract_strided_slice %2 {offsets = [0, 0], sizes = [48, 128], strides = [1, 1]} : vector<48x256xf32> to vector<48x128xf32>
    %4 = vector.extract_strided_slice %2 {offsets = [0, 128], sizes = [48, 128], strides = [1, 1]} : vector<48x256xf32> to vector<48x128xf32>
    %c0_3 = arith.constant 0 : index
    %c0_4 = arith.constant 0 : index
    %5 = vector.load %arg3[%c0_3, %c0_4] : memref<1x128xf32, #tpu.memory_space<vmem>>, vector<1x128xf32>
    %6 = vector.broadcast %5 : vector<1x128xf32> to vector<48x128xf32>
    %7 = arith.mulf %3, %6 : vector<48x128xf32>
    %c0_5 = arith.constant 0 : index
    %c0_6 = arith.constant 0 : index
    %8 = vector.load %arg4[%c0_5, %c0_6] : memref<1x128xf32, #tpu.memory_space<vmem>>, vector<1x128xf32>
    %9 = vector.broadcast %8 : vector<1x128xf32> to vector<48x128xf32>
    %10 = arith.addf %7, %9 : vector<48x128xf32>
    %cst_7 = arith.constant 0.000000e+00 : f32
    %11 = vector.broadcast %cst_7 : f32 to vector<48x128xf32>
    %12 = arith.cmpf ogt, %10, %11 : vector<48x128xf32>
    %13 = math.exp %10 : vector<48x128xf32>
    %cst_8 = arith.constant 1.000000e+00 : f32
    %14 = vector.broadcast %cst_8 : f32 to vector<48x128xf32>
    %15 = arith.subf %13, %14 : vector<48x128xf32>
    %cst_9 = arith.constant 1.67326319 : f32
    %16 = vector.broadcast %cst_9 : f32 to vector<48x128xf32>
    %17 = arith.mulf %16, %15 : vector<48x128xf32>
    %18 = arith.select %12, %10, %17 : vector<48x128xi1>, vector<48x128xf32>
    %cst_10 = arith.constant 1.05070102 : f32
    %19 = vector.broadcast %cst_10 : f32 to vector<48x128xf32>
    %20 = arith.mulf %19, %18 : vector<48x128xf32>
    %c0_11 = arith.constant 0 : index
    %c0_12 = arith.constant 0 : index
    %c0_13 = arith.constant 0 : index
    %21 = vector.load %arg2[%c0_11, %c0_12, %c0_13] : memref<2x128x128xf32, #tpu.memory_space<vmem>>, vector<1x128x128xf32>
    %22 = vector.shape_cast %21 : vector<1x128x128xf32> to vector<128x128xf32>
    %cst_14 = arith.constant dense<0.000000e+00> : vector<48x128xf32>
    %23 = tpu.matmul %20, %22, %cst_14 {dimension_numbers = #tpu.dot_dimension_numbers<[1], [0], [0], [1], [0, 0, 1, 1], [], []>} : vector<48x128xf32>, vector<128x128xf32>, vector<48x128xf32> -> vector<48x128xf32>
    %c0_15 = arith.constant 0 : index
    %c0_16 = arith.constant 0 : index
    %24 = vector.load %arg5[%c0_15, %c0_16] : memref<1x128xf32, #tpu.memory_space<vmem>>, vector<1x128xf32>
    %25 = vector.broadcast %24 : vector<1x128xf32> to vector<48x128xf32>
    %26 = arith.addf %23, %25 : vector<48x128xf32>
    %27 = arith.addf %26, %4 : vector<48x128xf32>
    %28 = vector.extract_strided_slice %20 {offsets = [1, 0], sizes = [47, 128], strides = [1, 1]} : vector<48x128xf32> to vector<47x128xf32>
    %c1 = arith.constant 1 : index
    %c0_17 = arith.constant 0 : index
    %c0_18 = arith.constant 0 : index
    %29 = vector.load %arg2[%c1, %c0_17, %c0_18] : memref<2x128x128xf32, #tpu.memory_space<vmem>>, vector<1x128x128xf32>
    %30 = vector.shape_cast %29 : vector<1x128x128xf32> to vector<128x128xf32>
    %cst_19 = arith.constant dense<0.000000e+00> : vector<47x128xf32>
    %31 = tpu.matmul %28, %30, %cst_19 {dimension_numbers = #tpu.dot_dimension_numbers<[1], [0], [0], [1], [0, 0, 1, 1], [], []>} : vector<47x128xf32>, vector<128x128xf32>, vector<47x128xf32> -> vector<47x128xf32>
    %32 = vector.extract_strided_slice %27 {offsets = [0, 0], sizes = [16, 128], strides = [1, 1]} : vector<48x128xf32> to vector<16x128xf32>
    %33 = vector.extract_strided_slice %31 {offsets = [0, 0], sizes = [16, 128], strides = [1, 1]} : vector<47x128xf32> to vector<16x128xf32>
    %34 = arith.addf %32, %33 : vector<16x128xf32>
    %c0_20 = arith.constant 0 : index
    %c0_21 = arith.constant 0 : index
    %c0_22 = arith.constant 0 : index
    %35 = vector.load %arg6[%c0_20, %c0_21, %c0_22] : memref<2x16x128xf32, #tpu.memory_space<vmem>>, vector<1x16x128xf32>
    %36 = vector.shape_cast %35 : vector<1x16x128xf32> to vector<16x128xf32>
    %37 = vector.shape_cast %34 : vector<16x128xf32> to vector<1x16x128xf32>
    tpu.vector_store %arg6[%c0_20, %c0_21, %c0_22], %37 {strides = array<i32>} : memref<2x16x128xf32, #tpu.memory_space<vmem>>, vector<1x16x128xf32>,
    %38 = vector.extract_strided_slice %27 {offsets = [24, 0], sizes = [16, 128], strides = [1, 1]} : vector<48x128xf32> to vector<16x128xf32>
    %39 = vector.extract_strided_slice %31 {offsets = [24, 0], sizes = [16, 128], strides = [1, 1]} : vector<47x128xf32> to vector<16x128xf32>
    %40 = arith.addf %38, %39 : vector<16x128xf32>
    %c1_23 = arith.constant 1 : index
    %c0_24 = arith.constant 0 : index
    %c0_25 = arith.constant 0 : index
    %41 = vector.load %arg6[%c1_23, %c0_24, %c0_25] : memref<2x16x128xf32, #tpu.memory_space<vmem>>, vector<1x16x128xf32>
    %42 = vector.shape_cast %41 : vector<1x16x128xf32> to vector<16x128xf32>
    %43 = vector.shape_cast %40 : vector<16x128xf32> to vector<1x16x128xf32>
    tpu.vector_store %arg6[%c1_23, %c0_24, %c0_25], %43 {strides = array<i32>} : memref<2x16x128xf32, #tpu.memory_space<vmem>>, vector<1x16x128xf32>,
    return
  }
}

</mosaic_0001>

<bundles_post_ra>
// kernel: residual_block_nchw.1
= control target key start
LH: loop header
LB: loop body
LE: loop exit
PB: predicated region body
PF: predicated region fallthrough
CT: control target
= control target key end

     0   :  { %v773_v3 = vmov 0.0   ;;  %vm371_vm2 = vcmask 1046528   ;;  %s1111_s1 = inlined_call_operand.vmem [shape: f32[128,256], index: 1, kind: input, shape index: {}]   ;;  %s1112_s2 = inlined_call_operand.vmem [shape: f32[2,128,128], index: 2, kind: input, shape index: {}]   ;;  %s1113_s0 = inlined_call_operand.vmem [shape: f32[48,128], index: 0, kind: input, shape index: {}]   ;;  %s1114_s3 = inlined_call_operand.vmem [shape: f32[1,128], index: 3, kind: input, shape index: {}]   ;;  %s1115_s4 = inlined_call_operand.vmem [shape: f32[1,128], index: 4, kind: input, shape index: {}]   ;;  %s1116_s5 = inlined_call_operand.vmem [shape: f32[1,128], index: 5, kind: input, shape index: {}]   ;;  %s1117_s6 = inlined_call_operand.vmem [shape: f32[2,16,128], index: 6, kind: output, shape index: {}]  }
   0x1   :  { %v30_v0 = vld [vmem:[%s1111_s1 + $0x8] sm:$0xff]  ;;  %v32_v1 = vld [vmem:[%s1111_s1 + $0x18] sm:$0xff]  ;;  %v29_v2 = vld [vmem:[%s1111_s1] sm:$0xff]  ;;  %125 = vmatprep.mubr.f32.mxu0 %v773_v3 }
   0x2   :  { %v648_v4 = vpack.c.bf16 %v32_v1, %v30_v0  ;;  %v31_v5 = vld [vmem:[%s1111_s1 + $0x10] sm:$0xff]  ;;  %v34_v6 = vld [vmem:[%s1111_s1 + $0x28] sm:$0xff]  ;;  %v36_v7 = vld [vmem:[%s1111_s1 + $0x38] sm:$0xff] }
   0x3   :  { %v650_v8 = vpack.c.bf16 %v31_v5, %v29_v2  ;;  %v652_v9 = vpack.c.bf16 %v36_v7, %v34_v6  ;;  %v33_v10 = vld [vmem:[%s1111_s1 + $0x20] sm:$0xff]  ;;  %v35_v11 = vld [vmem:[%s1111_s1 + $0x30] sm:$0xff]  ;;  %v38_v12 = vld [vmem:[%s1111_s1 + $0x48] sm:$0xff] }
   0x4   :  { %649 = vmatprep.subr.bf16.mxu0 %v648_v4  ;;  %v40_v13 = vld [vmem:[%s1111_s1 + $0x58] sm:$0xff]  ;;  %v654_v14 = vpack.c.bf16 %v35_v11, %v33_v10  ;;  %v37_v16 = vld [vmem:[%s1111_s1 + $0x40] sm:$0xff]  ;;  %v39_v17 = vld [vmem:[%s1111_s1 + $0x50] sm:$0xff] }
   0x5   :  { %651 = vmatpush1.bf16.msra.mxu0 %v650_v8  ;;  %v656_v15 = vpack.c.bf16 %v40_v13, %v38_v12  ;;  %v42_v18 = vld [vmem:[%s1111_s1 + $0x68] sm:$0xff]  ;;  %v44_v19 = vld [vmem:[%s1111_s1 + $0x78] sm:$0xff]  ;;  %v658_v20 = vpack.c.bf16 %v39_v17, %v37_v16  ;;  %v41_v22 = vld [vmem:[%s1111_s1 + $0x60] sm:$0xff] }
   0x6   :  { %653 = vmatprep.subr.bf16.mxu0 %v652_v9  ;;  %v660_v21 = vpack.c.bf16 %v44_v19, %v42_v18  ;;  %v43_v23 = vld [vmem:[%s1111_s1 + $0x70] sm:$0xff]  ;;  %v46_v24 = vld [vmem:[%s1111_s1 + $0x88] sm:$0xff]  ;;  %v48_v25 = vld [vmem:[%s1111_s1 + $0x98] sm:$0xff] }
   0x7   :  { %v662_v26 = vpack.c.bf16 %v43_v23, %v41_v22  ;;  %v228_v27 = vld [vmem:[%s1112_s2] sm:$0xff]  ;;  %v664_v28 = vpack.c.bf16 %v48_v25, %v46_v24  ;;  %v47_v30 = vld [vmem:[%s1111_s1 + $0x90] sm:$0xff]  ;;  %v229_v31 = vld [vmem:[%s1112_s2 + $0x8] sm:$0xff] }
   0x8   :  { %v45_v29 = vld [vmem:[%s1111_s1 + $0x80] sm:$0xff]  ;;  %v50_v32 = vld [vmem:[%s1111_s1 + $0xa8] sm:$0xff]  ;;  %v52_v33 = vld [vmem:[%s1111_s1 + $0xb8] sm:$0xff]  ;;  %v680_v34 = vpack.c.bf16 %v229_v31, %v228_v27 }
   0x9   :  { %655 = vmatpush1.bf16.msra.mxu0 %v654_v14  ;;  %v666_v35 = vpack.c.bf16 %v47_v30, %v45_v29  ;;  %v668_v36 = vpack.c.bf16 %v52_v33, %v50_v32  ;;  %v49_v37 = vld [vmem:[%s1111_s1 + $0xa0] sm:$0xff]  ;;  %v51_v38 = vld [vmem:[%s1111_s1 + $0xb0] sm:$0xff]  ;;  %v54_v39 = vld [vmem:[%s1111_s1 + $0xc8] sm:$0xff] }
   0xa   :  { %657 = vmatprep.subr.bf16.mxu0 %v656_v15  ;;  %681 = vmatprep.subr.bf16.mxu1 %v680_v34  ;;  %v56_v40 = vld [vmem:[%s1111_s1 + $0xd8] sm:$0xff]  ;;  %v670_v41 = vpack.c.bf16 %v51_v38, %v49_v37  ;;  %v53_v43 = vld [vmem:[%s1111_s1 + $0xc0] sm:$0xff]  ;;  %v55_v44 = vld [vmem:[%s1111_s1 + $0xd0] sm:$0xff] }
   0xb   :  { %683 = vmatpush3.bf16.msra.mxu1 %v680_v34  ;;  %v672_v42 = vpack.c.bf16 %v56_v40, %v54_v39  ;;  %v58_v45 = vld [vmem:[%s1111_s1 + $0xe8] sm:$0xff]  ;;  %v60_v46 = vld [vmem:[%s1111_s1 + $0xf8] sm:$0xff]  ;;  %v674_v47 = vpack.c.bf16 %v55_v44, %v53_v43  ;;  %v57_v49 = vld [vmem:[%s1111_s1 + $0xe0] sm:$0xff] }
   0xc   :  { %v676_v48 = vpack.c.bf16 %v60_v46, %v58_v45  ;;  %v59_v50 = vld [vmem:[%s1111_s1 + $0xf0] sm:$0xff]  ;;  %v23_v52 = vld [vmem:[%s1113_s0] sm:$0xff]  ;;  %v24_v53 = vld [vmem:[%s1113_s0 + $0x8] sm:$0xff] }
   0xd   :  { %659 = vmatpush1.bf16.msra.mxu0 %v658_v20  ;;  %v678_v51 = vpack.c.bf16 %v59_v50, %v57_v49  ;;  %v25_v54 = vld [vmem:[%s1113_s0 + $0x10] sm:$0xff]  ;;  %v26_v55 = vld [vmem:[%s1113_s0 + $0x18] sm:$0xff]  ;;  %v27_v56 = vld [vmem:[%s1113_s0 + $0x20] sm:$0xff] }
   0xe   :  { %661 = vmatprep.subr.bf16.mxu0 %v660_v21  ;;  %v28_v57 = vld [vmem:[%s1113_s0 + $0x28] sm:$0xff]  ;;  %v230_v58 = vld [vmem:[%s1112_s2 + $0x10] sm:$0xff]  ;;  %v231_v59 = vld [vmem:[%s1112_s2 + $0x18] sm:$0xff] }
   0xf   :  { %v684_v60 = vpack.c.bf16 %v231_v59, %v230_v58  ;;  %v232_v61 = vld [vmem:[%s1112_s2 + $0x20] sm:$0xff]  ;;  %v233_v62 = vld [vmem:[%s1112_s2 + $0x28] sm:$0xff]  ;;  %v235_v4 = vld [vmem:[%s1112_s2 + $0x38] sm:$0xff] }
  0x10   :  { %v688_v63 = vpack.c.bf16 %v233_v62, %v232_v61  ;;  %v504_v0 = vld [vmem:[%s1112_s2 + $0x80] sm:$0xff]  ;;  %v505_v1 = vld [vmem:[%s1112_s2 + $0x88] sm:$0xff]  ;;  %v506_v5 = vld [vmem:[%s1112_s2 + $0x90] sm:$0xff] }
  0x11   :  { %663 = vmatpush1.bf16.msra.mxu0 %v662_v26  ;;  %685 = vmatprep.subr.bf16.mxu1 %v684_v60  ;;  %v953_v2 = vpack.c.bf16 %v505_v1, %v504_v0  ;;  %v507_v7 = vld [vmem:[%s1112_s2 + $0x98] sm:$0xff]  ;;  %v236_v9 = vld [vmem:[%s1112_s2 + $0x40] sm:$0xff]  ;;  %v237_v10 = vld [vmem:[%s1112_s2 + $0x48] sm:$0xff] }
  0x12   :  { %665 = vmatprep.subr.bf16.mxu0 %v664_v28  ;;  %687 = vmatpush3.bf16.msra.mxu1 %v684_v60  ;;  %v969_v8 = vpack.c.bf16 %v507_v7, %v506_v5  ;;  %v508_v11 = vld [vmem:[%s1112_s2 + $0xa0] sm:$0xff]  ;;  %v696_v12 = vpack.c.bf16 %v237_v10, %v236_v9  ;;  %v509_v13 = vld [vmem:[%s1112_s2 + $0xa8] sm:$0xff]  ;;  %v238_v15 = vld [vmem:[%s1112_s2 + $0x50] sm:$0xff] }
  0x13   :  { %689 = vmatprep.subr.bf16.mxu1 %v688_v63  ;;  %v985_v14 = vpack.c.bf16 %v509_v13, %v508_v11  ;;  %v239_v16 = vld [vmem:[%s1112_s2 + $0x58] sm:$0xff]  ;;  %v510_v17 = vld [vmem:[%s1112_s2 + $0xb0] sm:$0xff]  ;;  %v240_v21 = vld [vmem:[%s1112_s2 + $0x60] sm:$0xff] }
  0x14   :  { %v700_v18 = vpack.c.bf16 %v239_v16, %v238_v15  ;;  %v511_v19 = vld [vmem:[%s1112_s2 + $0xb8] sm:$0xff]  ;;  %v241_v22 = vld [vmem:[%s1112_s2 + $0x68] sm:$0xff]  ;;  %v512_v23 = vld [vmem:[%s1112_s2 + $0xc0] sm:$0xff] }
  0x15   :  { %667 = vmatpush1.bf16.msra.mxu0 %v666_v35  ;;  %v1001_v20 = vpack.c.bf16 %v511_v19, %v510_v17  ;;  %v704_v24 = vpack.c.bf16 %v241_v22, %v240_v21  ;;  %v513_v25 = vld [vmem:[%s1112_s2 + $0xc8] sm:$0xff]  ;;  %v242_v27 = vld [vmem:[%s1112_s2 + $0x70] sm:$0xff]  ;;  %v243_v28 = vld [vmem:[%s1112_s2 + $0x78] sm:$0xff] }
  0x16   :  { %669 = vmatprep.subr.bf16.mxu0 %v668_v36  ;;  %691 = vmatpush3.bf16.msra.mxu1 %v688_v63  ;;  %v1017_v26 = vpack.c.bf16 %v513_v25, %v512_v23  ;;  %v514_v29 = vld [vmem:[%s1112_s2 + $0xd0] sm:$0xff]  ;;  %v708_v30 = vpack.c.bf16 %v243_v28, %v242_v27  ;;  %v515_v31 = vld [vmem:[%s1112_s2 + $0xd8] sm:$0xff]  ;;  %v516_v33 = vld [vmem:[%s1112_s2 + $0xe0] sm:$0xff] }
  0x17   :  { %v1033_v32 = vpack.c.bf16 %v515_v31, %v514_v29  ;;  %v517_v34 = vld [vmem:[%s1112_s2 + $0xe8] sm:$0xff]  ;;  %v518_v36 = vld [vmem:[%s1112_s2 + $0xf0] sm:$0xff]  ;;  %v519_v37 = vld [vmem:[%s1112_s2 + $0xf8] sm:$0xff] }
  0x18   :  { %v1044_v35 = vpack.c.bf16 %v517_v34, %v516_v33  ;;  %v1054_v38 = vpack.c.bf16 %v519_v37, %v518_v36  ;;  %v495_v39 = vld [vmem:[%s1114_s3] ss:$0 sm:$0xff] }
  0x19   :  { %671 = vmatpush1.bf16.msra.mxu0 %v670_v41  ;;  %v496_v41 = vld [vmem:[%s1115_s4] ss:$0 sm:$0xff] }
  0x1a   :  { %673 = vmatprep.subr.bf16.mxu0 %v672_v42 }
  0x1d   :  { %675 = vmatpush1.bf16.msra.mxu0 %v674_v47 }
  0x1e   :  { %677 = vmatprep.subr.bf16.mxu0 %v676_v48 }
  0x21   :  { %679 = vmatpush1.bf16.msra.mxu0 %v678_v51 }
  0x22   :  { %713 = vmatprep.subr.bf16.mxu0 %v953_v2 }
  0x24   :  { %126 = vmatmul.mubr.f32.vlgmr.msra.gmra.mrb[0].mxu0 %v23_v52 }
  0x25   :  { %131 = vmatprep.mubr.f32.mxu0 %v773_v3  ;;  %715 = vmatpush3.bf16.msra.mxu0 %v953_v2 }
  0x26   :  { %717 = vmatprep.subr.bf16.mxu0 %v969_v8 }
  0x28   :  { %132 = vmatmul.mubr.f32.gmra.mrb[2].mxu0 %v24_v53 }
  0x29   :  { %137 = vmatprep.mubr.f32.mxu0 %v773_v3  ;;  %719 = vmatpush3.bf16.msra.mxu0 %v969_v8 }
  0x2a   :  { %721 = vmatprep.subr.bf16.mxu0 %v985_v14 }
  0x2c   :  { %138 = vmatmul.mubr.f32.gmra.mrb[4].mxu0 %v25_v54 }
  0x2d   :  { %142 = vmatprep.mubr.f32.mxu0 %v773_v3  ;;  %723 = vmatpush3.bf16.msra.mxu0 %v985_v14 }
  0x2e   :  { %725 = vmatprep.subr.bf16.mxu0 %v1001_v20 }
  0x30   :  { %143 = vmatmul.mubr.f32.gmra.mrb[6].mxu0 %v26_v55 }
  0x31   :  { %148 = vmatprep.mubr.f32.mxu0 %v773_v3  ;;  %727 = vmatpush3.bf16.msra.mxu0 %v1001_v20 }
  0x32   :  { %729 = vmatprep.subr.bf16.mxu0 %v1017_v26 }
  0x34   :  { %149 = vmatmul.mubr.f32.gmra.mrb[8].mxu0 %v27_v56 }
  0x35   :  { %154 = vmatprep.mubr.f32.mxu0 %v773_v3  ;;  %v234_v3 = vld [vmem:[%s1112_s2 + $0x30] sm:$0xff]  ;;  %731 = vmatpush3.bf16.msra.mxu0 %v1017_v26 }
  0x36   :  { %v692_v6 = vpack.c.bf16 %v235_v4, %v234_v3  ;;  %733 = vmatprep.subr.bf16.mxu0 %v1033_v32 }
  0x38   :  { %155 = vmatmul.mubr.f32.gmra.mrb[10].mxu0 %v28_v57  ;;  %693 = vmatprep.subr.bf16.mxu1 %v692_v6 }
  0x39   :  { %695 = vmatpush3.bf16.msra.mxu1 %v692_v6  ;;  %735 = vmatpush3.bf16.msra.mxu0 %v1033_v32 }
  0x3a   :  { %697 = vmatprep.subr.bf16.mxu1 %v696_v12  ;;  %737 = vmatprep.subr.bf16.mxu0 %v1044_v35 }
  0x3d   :  { %699 = vmatpush3.bf16.msra.mxu1 %v696_v12  ;;  %739 = vmatpush3.bf16.msra.mxu0 %v1044_v35 }
  0x3e   :  { %701 = vmatprep.subr.bf16.mxu1 %v700_v18  ;;  %741 = vmatprep.subr.bf16.mxu0 %v1054_v38 }
  0x41   :  { %703 = vmatpush3.bf16.msra.mxu1 %v700_v18  ;;  %743 = vmatpush3.bf16.msra.mxu0 %v1054_v38 }
  0x42   :  { %705 = vmatprep.subr.bf16.mxu1 %v704_v24 }
  0x45   :  { %707 = vmatpush3.bf16.msra.mxu1 %v704_v24 }
  0x46   :  { %709 = vmatprep.subr.bf16.mxu1 %v708_v30 }
  0x49   :  { %711 = vmatpush3.bf16.msra.mxu1 %v708_v30 }
  0x4a   :  { %744 = vmatprep.subr.bf16.mxu1 %v953_v2 }
  0xf7   :  { %v127_v40 = vpop.f32.mrb[0].mxu0 }
  0xf8   :  { %v167_v42 = vmul.f32 %v495_v39, %v127_v40  ;;  %v1064_v43 = vpop.f32.mrb[1].mxu0 }
  0xfa   :  { %v180_v44 = vadd.f32 %v496_v41, %v167_v42 }
  0xfb   :  { %v133_v45 = vpop.f32.mrb[2].mxu0 }
  0xfc   :  { %v192_v46 = vmul.f32 1.442695, %v180_v44  ;;  %v168_v47 = vmul.f32 %v495_v39, %v133_v45  ;;  %v1066_v48 = vpop.f32.mrb[3].mxu0  ;;  %vm186_vm0 = vcmp.gt.f32.partialorder %v180_v44, 0.0 }
  0xfe   :  { %761 = vpow2.f32 %v192_v46  ;;  %v181_v49 = vadd.f32 %v496_v41, %v168_v47 }
  0xff   :  { %v139_v50 = vpop.f32.mrb[4].mxu0 }
 0x100   :  { %v194_v51 = vmul.f32 1.442695, %v181_v49  ;;  %v169_v52 = vmul.f32 %v495_v39, %v139_v50  ;;  %v141_v53 = vpop.f32.mrb[5].mxu0  ;;  %vm187_vm1 = vcmp.gt.f32.partialorder %v181_v49, 0.0 }
 0x102   :  { %763 = vpow2.f32 %v194_v51  ;;  %v182_v54 = vadd.f32 %v496_v41, %v169_v52 }
 0x103   :  { %v144_v55 = vpop.f32.mrb[6].mxu0 }
 0x104   :  { %v196_v56 = vmul.f32 1.442695, %v182_v54  ;;  %v170_v57 = vmul.f32 %v495_v39, %v144_v55  ;;  %v1068_v58 = vpop.f32.mrb[7].mxu0  ;;  %vm188_vm3 = vcmp.gt.f32.partialorder %v182_v54, 0.0 }
 0x106   :  { %765 = vpow2.f32 %v196_v56  ;;  %v183_v59 = vadd.f32 %v496_v41, %v170_v57 }
 0x107   :  { %v150_v60 = vpop.f32.mrb[8].mxu0 }
 0x108   :  { %v762_v61 = vpop.eup %761  ;;  %v198_v62 = vmul.f32 1.442695, %v183_v59  ;;  %v171_v63 = vmul.f32 %v495_v39, %v150_v60  ;;  %v1070_v0 = vpop.f32.mrb[9].mxu0  ;;  %vm189_vm4 = vcmp.gt.f32.partialorder %v183_v59, 0.0 }
 0x109   :  { %v497_v1 = vadd.f32 -1.0, %v762_v61 }
 0x10a   :  { %767 = vpow2.f32 %v198_v62  ;;  %v184_v3 = vadd.f32 %v496_v41, %v171_v63 }
 0x10b   :  { %v156_v4 = vpop.f32.mrb[10].mxu0  ;;  %v210_v5 = vmul.f32 1.6732632, %v497_v1 }
 0x10c   :  { %v764_v6 = vpop.eup %763  ;;  %v200_v7 = vmul.f32 1.442695, %v184_v3  ;;  %v172_v9 = vmul.f32 %v495_v39, %v156_v4  ;;  %v158_v10 = vpop.f32.mrb[11].mxu0  ;;  %vm190_vm5 = vcmp.gt.f32.partialorder %v184_v3, 0.0 }
 0x10d   :  { %v216_v11 = vsel %vm186_vm0, %v180_v44, %v210_v5  ;;  %v498_v12 = vadd.f32 -1.0, %v764_v6 }
 0x10e   :  { %769 = vpow2.f32 %v200_v7  ;;  %v185_v13 = vadd.f32 %v496_v41, %v172_v9  ;;  %v222_v15 = vmul.f32 1.050701, %v216_v11 }
 0x10f   :  { %v211_v16 = vmul.f32 1.6732632, %v498_v12 }
 0x110   :  { %v766_v17 = vpop.eup %765  ;;  %v202_v18 = vmul.f32 1.442695, %v185_v13  ;;  %598 = vmatprep.mubr.f32.mxu1 %v222_v15  ;;  %v372_v25 = vrot.slane %v222_v15, 1  ;;  %vm191_vm6 = vcmp.gt.f32.partialorder %v185_v13, 0.0 }
 0x111   :  { %v217_v19 = vsel %vm187_vm1, %v181_v49, %v211_v16  ;;  %v499_v21 = vadd.f32 -1.0, %v766_v17 }
 0x112   :  { %771 = vpow2.f32 %v202_v18  ;;  %v223_v22 = vmul.f32 1.050701, %v217_v19 }
 0x113   :  { %v212_v23 = vmul.f32 1.6732632, %v499_v21 }
 0x114   :  { %v768_v24 = vpop.eup %767  ;;  %599 = vmatmul.mubr.f32.vlgmr.msra.gmra.mrb[0].mxu1 %v223_v22  ;;  %v373_v27 = vrot.slane %v223_v22, 1 }
 0x115   :  { %752 = vmatpush3.bf16.msra.mxu1 %v953_v2  ;;  %v218_v28 = vsel %vm188_vm3, %v182_v54, %v212_v23  ;;  %v500_v29 = vadd.f32 -1.0, %v768_v24 }
 0x116   :  { %745 = vmatprep.subr.bf16.mxu1 %v969_v8  ;;  %v374_v30 = vsel %vm371_vm2, %v372_v25, %v373_v27  ;;  %v224_v31 = vmul.f32 1.050701, %v218_v28 }
 0x117   :  { %639 = vmatprep.mubr.f32.mxu0 %v374_v30  ;;  %v213_v33 = vmul.f32 1.6732632, %v500_v29 }
 0x118   :  { %v770_v34 = vpop.eup %769  ;;  %601 = vmatprep.mubr.f32.mxu1 %v224_v31  ;;  %v375_v36 = vrot.slane %v224_v31, 1 }
 0x119   :  { %753 = vmatpush3.bf16.msra.mxu1 %v969_v8  ;;  %v219_v37 = vsel %vm189_vm4, %v183_v59, %v213_v33  ;;  %v501_v39 = vadd.f32 -1.0, %v770_v34 }
 0x11a   :  { %746 = vmatprep.subr.bf16.mxu1 %v985_v14  ;;  %v376_v2 = vsel %vm371_vm2, %v373_v27, %v375_v36  ;;  %v225_v40 = vmul.f32 1.050701, %v219_v37 }
 0x11b   :  { %640 = vmatmul.mubr.f32.vlgmr.msra.gmra.mrb[12].mxu0 %v376_v2  ;;  %v214_v41 = vmul.f32 1.6732632, %v501_v39 }
 0x11c   :  { %v772_v42 = vpop.eup %771  ;;  %602 = vmatmul.mubr.f32.gmra.mrb[2].mxu1 %v225_v40  ;;  %v377_v44 = vrot.slane %v225_v40, 1 }
 0x11d   :  { %754 = vmatpush3.bf16.msra.mxu1 %v985_v14  ;;  %v220_v45 = vsel %vm190_vm5, %v184_v3, %v214_v41  ;;  %v502_v46 = vadd.f32 -1.0, %v772_v42 }
 0x11e   :  { %747 = vmatprep.subr.bf16.mxu1 %v1001_v20  ;;  %v226_v8 = vmul.f32 1.050701, %v220_v45  ;;  %v378_v47 = vsel %vm371_vm2, %v375_v36, %v377_v44 }
 0x11f   :  { %v215_v49 = vmul.f32 1.6732632, %v502_v46 }
 0x120   :  { %604 = vmatprep.mubr.f32.mxu1 %v226_v8  ;;  %v379_v50 = vrot.slane %v226_v8, 1 }
 0x121   :  { %755 = vmatpush3.bf16.msra.mxu1 %v1001_v20  ;;  %v221_v51 = vsel %vm191_vm6, %v185_v13, %v215_v49  ;;  %v503_v20 = vld [vmem:[%s1116_s5] ss:$0 sm:$0xff] }
 0x122   :  { %748 = vmatprep.subr.bf16.mxu1 %v1017_v26  ;;  %v227_v52 = vmul.f32 1.050701, %v221_v51  ;;  %v380_v53 = vsel %vm371_vm2, %v377_v44, %v379_v50 }
 0x124   :  { %605 = vmatmul.mubr.f32.gmra.mrb[4].mxu1 %v227_v52  ;;  %v381_v14 = vrot.slane %v227_v52, 1 }
 0x125   :  { %756 = vmatpush3.bf16.msra.mxu1 %v1017_v26  ;;  %642 = vmatprep.mubr.f32.mxu1 %v378_v47 }
 0x126   :  { %749 = vmatprep.subr.bf16.mxu1 %v1033_v32  ;;  %v382_v54 = vsel %vm371_vm2, %v379_v50, %v381_v14 }
 0x129   :  { %757 = vmatpush3.bf16.msra.mxu1 %v1033_v32 }
 0x12a   :  { %750 = vmatprep.subr.bf16.mxu1 %v1044_v35 }
 0x12d   :  { %758 = vmatpush3.bf16.msra.mxu1 %v1044_v35 }
 0x12e   :  { %751 = vmatprep.subr.bf16.mxu1 %v1054_v38 }
 0x131   :  { %759 = vmatpush3.bf16.msra.mxu1 %v1054_v38 }
 0x134   :  { %643 = vmatmul.mubr.f32.vlgmr.msra.gmra.mrb[6].mxu1 %v380_v53 }
 0x135   :  { %645 = vmatprep.mubr.f32.mxu1 %v382_v54 }
 0x138   :  { %646 = vmatmul.mubr.f32.gmra.mrb[8].mxu1 %v381_v14 }
 0x1e7   :  { %v600_v26 = vpop.f32.mrb[0].mxu1 }
 0x1e8   :  { %v323_v55 = vadd.f32 %v600_v26, %v503_v20  ;;  %v317_v56 = vpop.f32.mrb[1].mxu1 }
 0x1e9   :  { %v318_v57 = vadd.f32 %v503_v20, %v317_v56 }
 0x1ea   :  { %v345_v32 = vadd.f32 %v323_v55, %v1066_v48 }
 0x1eb   :  { %v344_v59 = vadd.f32 %v318_v57, %v1064_v43 }
 0x1ee   :  { %v641_v35 = vpop.f32.mrb[12].mxu0 }
 0x1ef   :  { %v483_v60 = vadd.f32 %v641_v35, %v345_v32  ;;  %v603_v61 = vpop.f32.mrb[2].mxu1  ;;  %v455_v62 = vpop.f32.mrb[13].mxu0 }
 0x1f0   :  { %v332_v38 = vadd.f32 %v603_v61, %v503_v20  ;;  %v482_v63 = vadd.f32 %v455_v62, %v344_v59  ;;  %v327_v1 = vpop.f32.mrb[3].mxu1 }
 0x1f1   :  { %485 = vst [vmem:[%s1117_s6 + $0x8] sm:$0xff] %v483_v60 }
 0x1f2   :  { %484 = vst [vmem:[%s1117_s6] sm:$0xff] %v482_v63  ;;  %v346_v3 = vadd.f32 %v332_v38, %v1068_v58 }
 0x1f7   :  { %v606_v48 = vpop.f32.mrb[4].mxu1 }
 0x1f8   :  { %v336_v4 = vpop.f32.mrb[5].mxu1 }
 0x1f9   :  { %v337_v43 = vadd.f32 %v503_v20, %v336_v4 }
 0x1fb   :  { %v347_v5 = vadd.f32 %v337_v43, %v1070_v0 }
 0x207   :  { %v644_v6 = vpop.f32.mrb[6].mxu1 }
 0x208   :  { %v486_v7 = vadd.f32 %v644_v6, %v346_v3  ;;  %v465_v9 = vpop.f32.mrb[7].mxu1 }
 0x20a   :  { %520 = vst [vmem:[%s1117_s6 + $0x10] sm:$0xff] %v486_v7 }
 0x20b   :  { %v647_v10 = vpop.f32.mrb[8].mxu1 }
 0x20c   :  { %v474_v11 = vpop.f32.mrb[9].mxu1 }
 0x20d   :  { %v487_v12 = vadd.f32 %v474_v11, %v347_v5 }
 0x20f   :  { %521 = vst [vmem:[%s1117_s6 + $0x18] sm:$0xff] %v487_v12 }

</bundles_post_ra>
